<compile_context>
chip_gen: v6e
topology: v6e:2x2x1
jax: 0.10.0
libtpu: 0.0.40
codegen_flags: <defaults>
</compile_context>

<pallas_src>
import jax
import jax.numpy as jnp
from jax import lax
from jax.experimental import pallas as pl
from jax.experimental.pallas import tpu as pltpu

HIDDEN = 256
LANE = 128


def soft_v_kernel(x_ref, w1_ref, b1_ref, w2_ref, b2_ref, w3_ref, b3_ref, o_ref):
    # x tile: (TM, obs_dim) f32 -> cast to bf16 on the VPU (no wrapper-side cast pass).
    x = x_ref[...].astype(jnp.bfloat16)

    # fc1 + ReLU  (bf16 MXU matmul, f32 accumulation; bias/activation in f32).
    h1 = jnp.dot(x, w1_ref[...], preferred_element_type=jnp.float32)
    h1 = jnp.maximum(h1 + b1_ref[...], 0.0)

    # fc2 + ReLU.
    h2 = jnp.dot(h1.astype(jnp.bfloat16), w2_ref[...],
                 preferred_element_type=jnp.float32)
    h2 = jnp.maximum(h2 + b2_ref[...], 0.0)

    # fc3 on the MXU: w3 replicated across 128 columns -> bc[i, c] == v_pre[i].
    bc = jnp.dot(h2.astype(jnp.bfloat16), w3_ref[...],
                 preferred_element_type=jnp.float32)          # (TM, 128) f32

    # Pack 128 consecutive rows into one lane-dense 128-wide row: element c of
    # sub-block g is the diagonal entry bc[g*128 + c, c].  Iota mask + sublane
    # reduce (VPU/XLU); no 128-lane broadcast, no wide HBM writeback.
    diag = (lax.broadcasted_iota(jnp.int32, (LANE, LANE), 0) ==
            lax.broadcasted_iota(jnp.int32, (LANE, LANE), 1))
    b3 = b3_ref[0]
    n_sub = o_ref.shape[0]                                    # tm // 128 (static)
    for g in range(n_sub):
        blk = bc[g * LANE:(g + 1) * LANE, :]                  # (128, 128) static slice
        row = jnp.sum(jnp.where(diag, blk, 0.0), axis=0, keepdims=True) + b3
        o_ref[pl.ds(g, 1), :] = row                           # (1, 128) dense store


def _round_up(n, m):
    return ((n + m - 1) // m) * m


def soft_v_forward(x, params, *, tm=512):
    """x: (B, obs_dim) f32.  Returns (B, 1) f32."""
    w1, b1, w2, b2, w3_rep, b3 = params
    B, obs_dim = x.shape

    # Pad batch to a multiple of 128 (one packed output lane-row per 128 batch rows).
    b_pad = _round_up(B, LANE)
    n_blk = b_pad // LANE

    # Pick the tile size in 128-row sub-blocks: as large as `tm` allows, but
    # guaranteeing >= 2 grid steps whenever the batch spans >= 2 sub-blocks
    # (pipeline overlap; megacore sharding on v7x), and always dividing b_pad.
    tgt = max(1, min(tm // LANE, n_blk))
    if tgt == n_blk and n_blk >= 2:
        tgt = (n_blk + 1) // 2
    while n_blk % tgt:
        tgt -= 1
    tm_eff = tgt * LANE
    num_tiles = b_pad // tm_eff
    n_sub = tm_eff // LANE

    x_pad = x if b_pad == B else jnp.pad(x, ((0, b_pad - B), (0, 0)))

    resident2d = lambda a: pl.BlockSpec(a.shape, lambda i: (0, 0))  # stays in VMEM

    out_packed = pl.pallas_call(
        soft_v_kernel,
        out_shape=jax.ShapeDtypeStruct((num_tiles, n_sub, LANE), jnp.float32),
        grid_spec=pltpu.PrefetchScalarGridSpec(
            num_scalar_prefetch=0,
            grid=(num_tiles,),
            in_specs=[
                pl.BlockSpec((tm_eff, obs_dim), lambda i: (i, 0)),   # x batch tile
                resident2d(w1), resident2d(b1),
                resident2d(w2), resident2d(b2),
                resident2d(w3_rep),
                pl.BlockSpec(memory_space=pltpu.MemorySpace.SMEM),   # b3 scalar
            ],
            out_specs=pl.BlockSpec((None, n_sub, LANE), lambda i: (i, 0, 0)),
        ),
        compiler_params=pltpu.CompilerParams(
            dimension_semantics=("parallel",),   # megacore sharding on v7x
        ),
    )(x_pad, w1, b1, w2, b2, w3_rep, b3)

    # Packed slab -> (B, 1): row i*tm_eff + g*128 + c lives at out_packed[i, g, c].
    return out_packed.reshape(b_pad)[:B].reshape(B, 1)


def init_params(key, obs_dim, hidden=HIDDEN):
    # Deterministic init mimicking torch.nn.Linear default (uniform +/- 1/sqrt(fan_in)).
    # Matmul weights stored as (in, out) bf16; fc3 stored replicated as (hidden, 128)
    # bf16 so it can run on the MXU.
    ks = jax.random.split(key, 6)

    def lin(kw, kb, fan_in, fan_out):
        bound = 1.0 / float(fan_in) ** 0.5
        w = jax.random.uniform(kw, (fan_in, fan_out), jnp.float32, -bound, bound)
        b = jax.random.uniform(kb, (fan_out,), jnp.float32, -bound, bound)
        return w, b

    w1, b1 = lin(ks[0], ks[1], obs_dim, hidden)
    w2, b2 = lin(ks[2], ks[3], hidden, hidden)
    w3, b3 = lin(ks[4], ks[5], hidden, 1)

    w3_rep = jnp.broadcast_to(w3.astype(jnp.bfloat16), (hidden, LANE))

    return (
        w1.astype(jnp.bfloat16), b1.reshape(1, hidden),
        w2.astype(jnp.bfloat16), b2.reshape(1, hidden),
        w3_rep,                                    # (hidden, 128) bf16, all cols == w3
        b3.reshape(1,),                            # scalar bias, lives in SMEM
    )


def reference_forward(x, params):
    # Mirrors the kernel's bf16-inputs / f32-accumulation numerics.
    w1, b1, w2, b2, w3_rep, b3 = params
    xb = x.astype(jnp.bfloat16)
    h1 = jnp.maximum(jnp.dot(xb, w1, preferred_element_type=jnp.float32) + b1, 0.0)
    h2 = jnp.maximum(
        jnp.dot(h1.astype(jnp.bfloat16), w2, preferred_element_type=jnp.float32) + b2, 0.0)
    v = jnp.dot(h2.astype(jnp.bfloat16), w3_rep[:, :1],
                preferred_element_type=jnp.float32) + b3
    return v


if __name__ == "__main__":
    key = jax.random.PRNGKey(0)
    k_x, k_p = jax.random.split(key)

    B, OBS_DIM = 2, 16  # small shapes consistent with a flat observation vector
    params = init_params(k_p, OBS_DIM)

    # Small deployment-style batch.
    x = jax.random.normal(k_x, (B, OBS_DIM), jnp.float32)
    out = jax.block_until_ready(soft_v_forward(x, params))
    ref = reference_forward(x, params)
    assert out.shape == (B, 1)
    assert jnp.allclose(out, ref, atol=1e-2, rtol=1e-2), "mismatch vs reference (B=2)"

    # Larger training-style batch: exercises multi-step grid, packed multi-row output
    # and batch padding.
    B2 = 1000
    x2 = jax.random.normal(k_x, (B2, OBS_DIM), jnp.float32)
    out2 = jax.block_until_ready(soft_v_forward(x2, params))
    ref2 = reference_forward(x2, params)
    assert out2.shape == (B2, 1)
    assert jnp.allclose(out2, ref2, atol=1e-2, rtol=1e-2), "mismatch vs reference (B=1000)"

    print("KERNEL_OK")
</pallas_src>

<mosaic_0001>
module attributes {stable_mosaic.version = 11 : i64} {
  func.func @soft_v_kernel(%arg0: i32, %arg1: memref<128x16xf32, #tpu.memory_space<vmem>>, %arg2: memref<16x256xbf16, #tpu.memory_space<vmem>>, %arg3: memref<1x256xf32, #tpu.memory_space<vmem>>, %arg4: memref<256x256xbf16, #tpu.memory_space<vmem>>, %arg5: memref<1x256xf32, #tpu.memory_space<vmem>>, %arg6: memref<256x128xbf16, #tpu.memory_space<vmem>>, %arg7: memref<1xf32, #tpu.memory_space<smem>>, %arg8: memref<1x1x128xf32, #tpu.memory_space<vmem>>) attributes {dimension_semantics = [#tpu.dimension_semantics<parallel>], iteration_bounds = array<i64: 1>, scalar_prefetch = 0 : i64, scratch_operands = 0 : i64, tpu.core_type = #tpu.core_type<tc>, window_params = [{transform_indices = @transform_0, window_bounds = array<i64: 128, 16>}, {pipeline_mode = #tpu.pipeline_mode<synchronous>, transform_indices = @transform_1, window_bounds = array<i64: 16, 256>}, {pipeline_mode = #tpu.pipeline_mode<synchronous>, transform_indices = @transform_2, window_bounds = array<i64: 1, 256>}, {pipeline_mode = #tpu.pipeline_mode<synchronous>, transform_indices = @transform_3, window_bounds = array<i64: 256, 256>}, {pipeline_mode = #tpu.pipeline_mode<synchronous>, transform_indices = @transform_4, window_bounds = array<i64: 1, 256>}, {pipeline_mode = #tpu.pipeline_mode<synchronous>, transform_indices = @transform_5, window_bounds = array<i64: 256, 128>}, {transform_indices = @transform_6, window_bounds = array<i64: 1>}, {transform_indices = @transform_7, window_bounds = array<i64: 1, 1, 128>}]} {
    %c0 = arith.constant 0 : index
    %c0_0 = arith.constant 0 : index
    %0 = vector.load %arg1[%c0, %c0_0] : memref<128x16xf32, #tpu.memory_space<vmem>>, vector<128x16xf32>
    %1 = arith.truncf %0 : vector<128x16xf32> to vector<128x16xbf16>
    %c0_1 = arith.constant 0 : index
    %c0_2 = arith.constant 0 : index
    %2 = vector.load %arg2[%c0_1, %c0_2] : memref<16x256xbf16, #tpu.memory_space<vmem>>, vector<16x256xbf16>
    %cst = arith.constant dense<0.000000e+00> : vector<128x256xf32>
    %3 = tpu.matmul %1, %2, %cst {dimension_numbers = #tpu.dot_dimension_numbers<[1], [0], [0], [1], [0, 0, 1, 1], [], []>} : vector<128x16xbf16>, vector<16x256xbf16>, vector<128x256xf32> -> vector<128x256xf32>
    %c0_3 = arith.constant 0 : index
    %c0_4 = arith.constant 0 : index
    %4 = vector.load %arg3[%c0_3, %c0_4] : memref<1x256xf32, #tpu.memory_space<vmem>>, vector<1x256xf32>
    %5 = vector.broadcast %4 : vector<1x256xf32> to vector<128x256xf32>
    %6 = arith.addf %3, %5 : vector<128x256xf32>
    %cst_5 = arith.constant 0.000000e+00 : f32
    %7 = vector.broadcast %cst_5 : f32 to vector<128x256xf32>
    %8 = arith.maximumf %6, %7 : vector<128x256xf32>
    %9 = arith.truncf %8 : vector<128x256xf32> to vector<128x256xbf16>
    %c0_6 = arith.constant 0 : index
    %c0_7 = arith.constant 0 : index
    %10 = vector.load %arg4[%c0_6, %c0_7] : memref<256x256xbf16, #tpu.memory_space<vmem>>, vector<256x256xbf16>
    %cst_8 = arith.constant dense<0.000000e+00> : vector<128x256xf32>
    %11 = tpu.matmul %9, %10, %cst_8 {dimension_numbers = #tpu.dot_dimension_numbers<[1], [0], [0], [1], [0, 0, 1, 1], [], []>} : vector<128x256xbf16>, vector<256x256xbf16>, vector<128x256xf32> -> vector<128x256xf32>
    %c0_9 = arith.constant 0 : index
    %c0_10 = arith.constant 0 : index
    %12 = vector.load %arg5[%c0_9, %c0_10] : memref<1x256xf32, #tpu.memory_space<vmem>>, vector<1x256xf32>
    %13 = vector.broadcast %12 : vector<1x256xf32> to vector<128x256xf32>
    %14 = arith.addf %11, %13 : vector<128x256xf32>
    %cst_11 = arith.constant 0.000000e+00 : f32
    %15 = vector.broadcast %cst_11 : f32 to vector<128x256xf32>
    %16 = arith.maximumf %14, %15 : vector<128x256xf32>
    %17 = arith.truncf %16 : vector<128x256xf32> to vector<128x256xbf16>
    %c0_12 = arith.constant 0 : index
    %c0_13 = arith.constant 0 : index
    %18 = vector.load %arg6[%c0_12, %c0_13] : memref<256x128xbf16, #tpu.memory_space<vmem>>, vector<256x128xbf16>
    %cst_14 = arith.constant dense<0.000000e+00> : vector<128x128xf32>
    %19 = tpu.matmul %17, %18, %cst_14 {dimension_numbers = #tpu.dot_dimension_numbers<[1], [0], [0], [1], [0, 0, 1, 1], [], []>} : vector<128x256xbf16>, vector<256x128xbf16>, vector<128x128xf32> -> vector<128x128xf32>
    %20 = tpu.iota {dimensions = array<i32: 0>} : vector<128x128xi32>
    %21 = tpu.iota {dimensions = array<i32: 1>} : vector<128x128xi32>
    %22 = arith.cmpi eq, %20, %21 : vector<128x128xi32>
    %c0_15 = arith.constant 0 : index
    %23 = memref.load %arg7[%c0_15] : memref<1xf32, #tpu.memory_space<smem>>
    %cst_16 = arith.constant 0.000000e+00 : f32
    %24 = vector.broadcast %cst_16 : f32 to vector<128x128xf32>
    %25 = arith.select %22, %19, %24 : vector<128x128xi1>, vector<128x128xf32>
    %cst_17 = arith.constant dense<0.000000e+00> : vector<128xf32>
    %26 = vector.multi_reduction <add>, %25, %cst_17 [0] : vector<128x128xf32> to vector<128xf32>
    %27 = vector.shape_cast %26 : vector<128xf32> to vector<1x128xf32>
    %28 = vector.broadcast %23 : f32 to vector<1x128xf32>
    %29 = arith.addf %27, %28 : vector<1x128xf32>
    %c0_18 = arith.constant 0 : index
    %c0_19 = arith.constant 0 : index
    %c0_20 = arith.constant 0 : index
    %30 = vector.load %arg8[%c0_18, %c0_19, %c0_20] : memref<1x1x128xf32, #tpu.memory_space<vmem>>, vector<1x1x128xf32>
    %31 = vector.shape_cast %30 : vector<1x1x128xf32> to vector<1x128xf32>
    %32 = vector.shape_cast %29 : vector<1x128xf32> to vector<1x1x128xf32>
    tpu.vector_store %arg8[%c0_18, %c0_19, %c0_20], %32 {strides = array<i32>} : memref<1x1x128xf32, #tpu.memory_space<vmem>>, vector<1x1x128xf32>,
    return
  }
  func.func @transform_0(%arg0: i32) -> (i32, i32) {
    %c0_i32 = arith.constant 0 : i32
    %c0_i32_0 = arith.constant 0 : i32
    return %arg0, %c0_i32 : i32, i32
  }
  func.func @transform_1(%arg0: i32) -> (i32, i32) {
    %c0_i32 = arith.constant 0 : i32
    %c0_i32_0 = arith.constant 0 : i32
    %c0_i32_1 = arith.constant 0 : i32
    return %c0_i32, %c0_i32_0 : i32, i32
  }
  func.func @transform_2(%arg0: i32) -> (i32, i32) {
    %c0_i32 = arith.constant 0 : i32
    %c0_i32_0 = arith.constant 0 : i32
    %c0_i32_1 = arith.constant 0 : i32
    return %c0_i32, %c0_i32_0 : i32, i32
  }
  func.func @transform_3(%arg0: i32) -> (i32, i32) {
    %c0_i32 = arith.constant 0 : i32
    %c0_i32_0 = arith.constant 0 : i32
    %c0_i32_1 = arith.constant 0 : i32
    return %c0_i32, %c0_i32_0 : i32, i32
  }
  func.func @transform_4(%arg0: i32) -> (i32, i32) {
    %c0_i32 = arith.constant 0 : i32
    %c0_i32_0 = arith.constant 0 : i32
    %c0_i32_1 = arith.constant 0 : i32
    return %c0_i32, %c0_i32_0 : i32, i32
  }
  func.func @transform_5(%arg0: i32) -> (i32, i32) {
    %c0_i32 = arith.constant 0 : i32
    %c0_i32_0 = arith.constant 0 : i32
    %c0_i32_1 = arith.constant 0 : i32
    return %c0_i32, %c0_i32_0 : i32, i32
  }
  func.func @transform_6(%arg0: i32) -> i32 {
    %c0_i32 = arith.constant 0 : i32
    %c0_i32_0 = arith.constant 0 : i32
    return %c0_i32 : i32
  }
  func.func @transform_7(%arg0: i32) -> (i32, i32, i32) {
    %c0_i32 = arith.constant 0 : i32
    %c0_i32_0 = arith.constant 0 : i32
    %c0_i32_1 = arith.constant 0 : i32
    return %arg0, %c0_i32, %c0_i32_0 : i32, i32, i32
  }
}

</mosaic_0001>

<bundles_post_ra>
// kernel: tpu_custom_call.1
= control target key start
LH: loop header
LB: loop body
LE: loop exit
PB: predicated region body
PF: predicated region fallthrough
CT: control target
= control target key end

     0   :  { %13 = vsyncpa [#allocation4], 0  ;;  %s1494_s0 = inlined_call_operand.vmem [shape: f32[128,16], index: 0, kind: input, shape index: {}]   ;;  %s1495_s1 = inlined_call_operand.vmem [shape: bf16[16,256], index: 1, kind: input, shape index: {}]   ;;  %s1496_s2 = inlined_call_operand.vmem [shape: f32[1,256], index: 2, kind: input, shape index: {}]   ;;  %s1497_s3 = inlined_call_operand.hbm [shape: bf16[256,256], index: 3, kind: input, shape index: {}]   ;;  %s1498_s4 = inlined_call_operand.vmem [shape: f32[1,256], index: 4, kind: input, shape index: {}]   ;;  %s1499_s5 = inlined_call_operand.vmem [shape: bf16[256,128], index: 5, kind: input, shape index: {}]   ;;  %s1500_s6 = inlined_call_operand.<no memory space> [shape: f32[1], index: 6, kind: input, shape index: {}]   ;;  %s1501_s7 = inlined_call_operand.hbm [shape: f32[1,1,128], index: 7, kind: output, shape index: {}]  }
   0x1   :  { %14 = vsyncpa [#allocation5], 0  ;;  %s1196_s24 = smov [#allocation3]  }
   0x2   :  { %s26_s25 = sshll.u32 %s1196_s24, 4  ;;  %s27_s25 = int_to_ptr.vmem [resolvable:$true] %s26_s25 }
   0x3   :  { %s1160_s26 = scalar_lea.vmem %s27_s25, 4096  ;;  %p1165_p1 = scmp.lt.s32.totalorder %s27_s25, %s27_s25 }
   0x4   :  { %p1161_p0 = scmp.ne.s32.totalorder %s27_s25, %s1160_s26  ;;  %p1166_p2 = scmp.lt.s32.totalorder %s1160_s26, %s1160_s26 }
   0x6   :  { %p1167_p3 = por %p1166_p2, %p1165_p1 }
   0x8   :  { %p1168_p4 = pnand %p1167_p3, %p1161_p0 }
   0xa   :  { %1171 = shalt.err (!%p1168_p4)
}
   0xb   :  { %s1197_s27 = smov 128   ;;  %s1198_s28 = smov 8  }
   0xc   :  { %32 = dma.hbm_to_vmem [thread:$0]  %s1497_s3, 4096, %s27_s25, [#allocation4], %s1197_s27, %s1197_s27, %s1198_s28  }
   0xd   :  { %1192 = dma.done.wait [#allocation4], 4096  }
   0xe   :  { %1193 = vsyncadd [#allocation4], 4294963200  ;;  %v1199_v0 = vmov 0   ;;  %v1085_v1 = vld [vmem:[%s1495_s1 + $0x4] ss:$8 sps:$4 sm:$0xff]   ;;  %vm91_vm0 = vcmask 130048  }
   0xf   :  { %148 = vmatprep.mubr.bf16.mxu0 %v1199_v0  ;;  %v1087_v2 = vld [vmem:[%s1495_s1] ss:$8 sps:$4 sm:$0xff]   ;;  %130 = vmatprep.subr.bf16.mxu0 %v1085_v1  ;;  %v45_v6 = vld [vmem:[%s1494_s0 + $0x10] sm:$0xff]  ;;  %v46_v7 = vld [vmem:[%s1494_s0 + $0x18] sm:$0xff]  ;;  %s1200_s25 = smov [#allocation6]  }
  0x10   :  { %v43_v3 = vld [vmem:[%s1494_s0] sm:$0xff]  ;;  %v44_v4 = vld [vmem:[%s1494_s0 + $0x8] sm:$0xff]  ;;  %131 = vmatpush1.bf16.msra.mxu0 %v1087_v2  ;;  %v1088_v8 = vld [vmem:[#allocation3 + $0x74] ss:$8 sps:$4 sm:$0xff]   ;;  %v60_v11 = vpack.c.bf16 %v46_v7, %v45_v6  ;;  %s949_s26 = sshll.u32 %s1200_s25, 4  ;;  %s950_s26 = int_to_ptr.vmem [resolvable:$true] %s949_s26 }
  0x11   :  { %v59_v5 = vpack.c.bf16 %v44_v4, %v43_v3  ;;  %v1090_v9 = vld [vmem:[#allocation3 + $0x70] ss:$8 sps:$4 sm:$0xff]   ;;  %v1091_v10 = vld [vmem:[#allocation3 + $0x64] ss:$8 sps:$4 sm:$0xff]   ;;  %481 = vmatprep.subr.bf16.mxu1 %v1088_v8  ;;  %v1093_v12 = vld [vmem:[#allocation3 + $0x60] ss:$8 sps:$4 sm:$0xff]   ;;  %p1177_p6 = scmp.lt.s32.totalorder %s950_s26, %s950_s26 }
  0x12   :  { %482 = vmatpush1.bf16.msra.mxu1 %v1090_v9  ;;  %v1094_v13 = vld [vmem:[#allocation3 + $0x54] ss:$8 sps:$4 sm:$0xff]   ;;  %v47_v14 = vld [vmem:[%s1494_s0 + $0x20] sm:$0xff]  ;;  %v1096_v15 = vld [vmem:[#allocation3 + $0x50] ss:$8 sps:$4 sm:$0xff]   ;;  %v71_v9 = vlaneseq  ;;  %s1172_s27 = scalar_lea.vmem %s950_s26, 16 }
  0x13   :  { %960 = vmatmul.mubr.msk.bf16.vlgmr.msra.gmra.mxu0 %vm91_vm0, %v59_v5  ;;  %483 = vmatprep.subr.bf16.mxu1 %v1091_v10  ;;  %v48_v16 = vld [vmem:[%s1494_s0 + $0x28] sm:$0xff]  ;;  %v1100_v20 = vld [vmem:[#allocation3 + $0x34] ss:$8 sps:$4 sm:$0xff]   ;;  %v1102_v22 = vld [vmem:[#allocation3 + $0x30] ss:$8 sps:$4 sm:$0xff]   ;;  %p1173_p5 = scmp.ne.s32.totalorder %s950_s26, %s1172_s27  ;;  %s1176_s28 = scalar_lea.vmem %s950_s26, 32 }
  0x14   :  { %158 = vmatprep.mubr.bf16.mxu0 %v1199_v0  ;;  %v1097_v17 = vld [vmem:[#allocation3 + $0x44] ss:$8 sps:$4 sm:$0xff]   ;;  %v61_v18 = vpack.c.bf16 %v48_v16, %v47_v14  ;;  %v1099_v19 = vld [vmem:[#allocation3 + $0x40] ss:$8 sps:$4 sm:$0xff]   ;;  %v49_v21 = vld [vmem:[%s1494_s0 + $0x30] sm:$0xff]  ;;  %v1357_v10 = vshrl.u32 %v71_v9, 7  ;;  %p1178_p7 = scmp.lt.s32.totalorder %s1176_s28, %s1172_s27 }
  0x15   :  { %v50_v23 = vld [vmem:[%s1494_s0 + $0x38] sm:$0xff]  ;;  %v1103_v24 = vld [vmem:[#allocation3 + $0x24] ss:$8 sps:$4 sm:$0xff]   ;;  %v1105_v25 = vld [vmem:[#allocation3 + $0x20] ss:$8 sps:$4 sm:$0xff]  }
  0x16   :  { %484 = vmatpush1.bf16.msra.mxu1 %v1093_v12  ;;  %v1106_v26 = vld [vmem:[#allocation3 + $0x14] ss:$8 sps:$4 sm:$0xff]   ;;  %v62_v27 = vpack.c.bf16 %v50_v23, %v49_v21  ;;  %v1108_v28 = vld [vmem:[#allocation3 + $0x10] ss:$8 sps:$4 sm:$0xff]   ;;  %v51_v29 = vld [vmem:[%s1494_s0 + $0x40] sm:$0xff]  ;;  %v73_v12 = vsub.s32 0, %v1357_v10  ;;  %p1179_p8 = por %p1178_p7, %p1177_p6 }
  0x17   :  { %485 = vmatprep.subr.bf16.mxu1 %v1094_v13  ;;  %v52_v30 = vld [vmem:[%s1494_s0 + $0x48] sm:$0xff]  ;;  %v1112_v33 = vld [vmem:[#allocation3 + $0xf4] ss:$8 sps:$4 sm:$0xff]   ;;  %v1114_v35 = vld [vmem:[#allocation3 + $0xf0] ss:$8 sps:$4 sm:$0xff]  }
  0x18   :  { %v1109_v31 = vld [vmem:[#allocation3 + $0x4] ss:$8 sps:$4 sm:$0xff]   ;;  %v1111_v32 = vld [vmem:[#allocation3] ss:$8 sps:$4 sm:$0xff]   ;;  %v63_v34 = vpack.c.bf16 %v52_v30, %v51_v29  ;;  %v53_v36 = vld [vmem:[%s1494_s0 + $0x50] sm:$0xff]  ;;  %p1180_p9 = pnand %p1179_p8, %p1173_p5 }
  0x19   :  { %v54_v37 = vld [vmem:[%s1494_s0 + $0x58] sm:$0xff]  ;;  %v1115_v38 = vld [vmem:[#allocation3 + $0xe4] ss:$8 sps:$4 sm:$0xff]   ;;  %v1117_v40 = vld [vmem:[#allocation3 + $0xe0] ss:$8 sps:$4 sm:$0xff]  }
  0x1a   :  { %486 = vmatpush1.bf16.msra.mxu1 %v1096_v15  ;;  %v64_v39 = vpack.c.bf16 %v54_v37, %v53_v36  ;;  %v1118_v41 = vld [vmem:[#allocation3 + $0xd4] ss:$8 sps:$4 sm:$0xff]   ;;  %v1120_v42 = vld [vmem:[#allocation3 + $0xd0] ss:$8 sps:$4 sm:$0xff]   ;;  %v55_v43 = vld [vmem:[%s1494_s0 + $0x60] sm:$0xff] }
  0x1b   :  { %961 = vmatmul.mubr.msk.bf16.gmra.mxu0 %vm91_vm0, %v60_v11  ;;  %487 = vmatprep.subr.bf16.mxu1 %v1097_v17  ;;  %v56_v44 = vld [vmem:[%s1494_s0 + $0x68] sm:$0xff]  ;;  %v1124_v48 = vld [vmem:[#allocation3 + $0xb4] ss:$8 sps:$4 sm:$0xff]   ;;  %v1126_v49 = vld [vmem:[#allocation3 + $0xb0] ss:$8 sps:$4 sm:$0xff]   ;;  %v77_v11 = vsub.s32 1, %v1357_v10 }
  0x1c   :  { %168 = vmatprep.mubr.bf16.mxu0 %v1199_v0  ;;  %v1121_v45 = vld [vmem:[#allocation3 + $0xc4] ss:$8 sps:$4 sm:$0xff]   ;;  %v65_v46 = vpack.c.bf16 %v56_v44, %v55_v43  ;;  %v1123_v47 = vld [vmem:[#allocation3 + $0xc0] ss:$8 sps:$4 sm:$0xff]   ;;  %v57_v50 = vld [vmem:[%s1494_s0 + $0x70] sm:$0xff] }
  0x1d   :  { %v58_v51 = vld [vmem:[%s1494_s0 + $0x78] sm:$0xff]  ;;  %v1127_v53 = vld [vmem:[#allocation3 + $0xa4] ss:$8 sps:$4 sm:$0xff]   ;;  %v1129_v54 = vld [vmem:[#allocation3 + $0xa0] ss:$8 sps:$4 sm:$0xff]  }
  0x1e   :  { %488 = vmatpush1.bf16.msra.mxu1 %v1099_v19  ;;  %v66_v52 = vpack.c.bf16 %v58_v51, %v57_v50  ;;  %v1130_v55 = vld [vmem:[#allocation3 + $0x94] ss:$8 sps:$4 sm:$0xff]   ;;  %v1132_v56 = vld [vmem:[#allocation3 + $0x90] ss:$8 sps:$4 sm:$0xff]   ;;  %v1133_v57 = vld [vmem:[#allocation3 + $0x84] ss:$8 sps:$4 sm:$0xff]  }
  0x1f   :  { %489 = vmatprep.subr.bf16.mxu1 %v1100_v20  ;;  %v1135_v58 = vld [vmem:[#allocation3 + $0x80] ss:$8 sps:$4 sm:$0xff]   ;;  %v1136_v59 = vld [vmem:[%s1499_s5 + $0x78] sm:$0xff]   ;;  %v1138_v61 = vld [vmem:[%s1499_s5 + $0x70] sm:$0xff]  }
  0x20   :  { %v1137_v60 = vld [vmem:[%s1499_s5 + $0x38] sm:$0xff]   ;;  %1016 = vmatprep.subr.bf16.mxu0 %v1136_v59  ;;  %v1139_v62 = vld [vmem:[%s1499_s5 + $0x30] sm:$0xff]   ;;  %v1140_v63 = vld [vmem:[%s1499_s5 + $0x68] sm:$0xff]  }
  0x21   :  { %1017 = vmatpush3.bf16.msra.mxu0 %v1137_v60  ;;  %v1142_v1 = vld [vmem:[%s1499_s5 + $0x60] sm:$0xff]   ;;  %v1144_v3 = vld [vmem:[%s1499_s5 + $0x58] sm:$0xff]   ;;  %v1146_v5 = vld [vmem:[%s1499_s5 + $0x50] sm:$0xff]  }
  0x22   :  { %490 = vmatpush1.bf16.msra.mxu1 %v1102_v22  ;;  %1018 = vmatprep.subr.bf16.mxu0 %v1138_v61  ;;  %v1143_v2 = vld [vmem:[%s1499_s5 + $0x20] sm:$0xff]   ;;  %v1145_v4 = vld [vmem:[%s1499_s5 + $0x18] sm:$0xff]   ;;  %v1147_v6 = vld [vmem:[%s1499_s5 + $0x10] sm:$0xff]  }
  0x23   :  { %962 = vmatmul.mubr.msk.bf16.gmra.mxu0 %vm91_vm0, %v61_v18  ;;  %491 = vmatprep.subr.bf16.mxu1 %v1103_v24  ;;  %v1148_v7 = vld [vmem:[%s1499_s5 + $0x48] sm:$0xff]   ;;  %v69_v13 = vld [vmem:[%s1496_s2] sm:$0x3] }
  0x24   :  { %178 = vmatprep.mubr.bf16.mxu0 %v1199_v0  ;;  %v1149_v8 = vld [vmem:[%s1499_s5 + $0x8] sm:$0xff]   ;;  %v1366_v15 = vrot.slane %v69_v13, %v77_v11  ;;  %v1370_v16 = vrot.slane %v69_v13, %v73_v12 }
  0x25   :  { %1019 = vmatpush3.bf16.msra.mxu0 %v1139_v62 }
  0x26   :  { %492 = vmatpush1.bf16.msra.mxu1 %v1105_v25  ;;  %1020 = vmatprep.subr.bf16.mxu0 %v1140_v63 }
  0x27   :  { %493 = vmatprep.subr.bf16.mxu1 %v1106_v26 }
  0x2a   :  { %494 = vmatpush1.bf16.msra.mxu1 %v1108_v28 }
  0x2b   :  { %963 = vmatmul.mubr.msk.bf16.gmra.mxu0 %vm91_vm0, %v62_v27  ;;  %495 = vmatprep.subr.bf16.mxu1 %v1109_v31 }
  0x2c   :  { %188 = vmatprep.mubr.bf16.mxu0 %v1199_v0 }
  0x2e   :  { %496 = vmatpush1.bf16.msra.mxu1 %v1111_v32 }
  0x2f   :  { %497 = vmatprep.subr.bf16.mxu1 %v1112_v33 }
  0x32   :  { %498 = vmatpush2.bf16.msra.mxu1 %v1114_v35 }
  0x33   :  { %964 = vmatmul.mubr.msk.bf16.gmra.mxu0 %vm91_vm0, %v63_v34  ;;  %499 = vmatprep.subr.bf16.mxu1 %v1115_v38 }
  0x34   :  { %198 = vmatprep.mubr.bf16.mxu0 %v1199_v0 }
  0x36   :  { %500 = vmatpush2.bf16.msra.mxu1 %v1117_v40 }
  0x37   :  { %501 = vmatprep.subr.bf16.mxu1 %v1118_v41 }
  0x3a   :  { %502 = vmatpush2.bf16.msra.mxu1 %v1120_v42 }
  0x3b   :  { %965 = vmatmul.mubr.msk.bf16.gmra.mxu0 %vm91_vm0, %v64_v39  ;;  %503 = vmatprep.subr.bf16.mxu1 %v1121_v45 }
  0x3c   :  { %208 = vmatprep.mubr.bf16.mxu0 %v1199_v0 }
  0x3e   :  { %504 = vmatpush2.bf16.msra.mxu1 %v1123_v47 }
  0x3f   :  { %505 = vmatprep.subr.bf16.mxu1 %v1124_v48 }
  0x42   :  { %506 = vmatpush2.bf16.msra.mxu1 %v1126_v49 }
  0x43   :  { %966 = vmatmul.mubr.msk.bf16.gmra.mxu0 %vm91_vm0, %v65_v46  ;;  %507 = vmatprep.subr.bf16.mxu1 %v1127_v53 }
  0x44   :  { %218 = vmatprep.mubr.bf16.mxu0 %v1199_v0  ;;  %v1141_v0 = vld [vmem:[%s1499_s5 + $0x28] sm:$0xff]  }
  0x45   :  { %1021 = vmatpush3.bf16.msra.mxu0 %v1141_v0 }
  0x46   :  { %508 = vmatpush2.bf16.msra.mxu1 %v1129_v54  ;;  %1022 = vmatprep.subr.bf16.mxu0 %v1142_v1 }
  0x47   :  { %509 = vmatprep.subr.bf16.mxu1 %v1130_v55 }
  0x49   :  { %1023 = vmatpush3.bf16.msra.mxu0 %v1143_v2 }
  0x4a   :  { %510 = vmatpush2.bf16.msra.mxu1 %v1132_v56  ;;  %1024 = vmatprep.subr.bf16.mxu0 %v1144_v3 }
  0x4b   :  { %967 = vmatmul.mubr.msk.bf16.gmra.mxu0 %vm91_vm0, %v66_v52  ;;  %511 = vmatprep.subr.bf16.mxu1 %v1133_v57 }
  0x4d   :  { %1025 = vmatpush3.bf16.msra.mxu0 %v1145_v4 }
  0x4e   :  { %512 = vmatpush2.bf16.msra.mxu1 %v1135_v58  ;;  %1026 = vmatprep.subr.bf16.mxu0 %v1146_v5 }
  0x51   :  { %1027 = vmatpush3.bf16.msra.mxu0 %v1147_v6 }
  0x52   :  { %1028 = vmatprep.subr.bf16.mxu0 %v1148_v7 }
  0x55   :  { %1029 = vmatpush3.bf16.msra.mxu0 %v1149_v8 }
  0xd3   :  { %v150_v14 = vpop.f32.mrf.mxu0 }
  0xd4   :  { %v151_v21 = vadd.f32 %v150_v14, %v1370_v16 }
  0xd5   :  { %v152_v17 = vpop.f32.mrf.mxu0 }
  0xd6   :  { %v153_v19 = vadd.f32 %v152_v17, %v1366_v15  ;;  %v229_v28 = vmax.f32 %v151_v21, 0.0 }
  0xd7   :  { %v154_v18 = vpop.f32.mrf.mxu0 }
  0xd8   :  { %v155_v20 = vadd.f32 %v154_v18, %v1370_v16  ;;  %v230_v26 = vmax.f32 %v153_v19, 0.0 }
  0xd9   :  { %v156_v22 = vpop.f32.mrf.mxu0 }
  0xda   :  { %v157_v23 = vadd.f32 %v156_v22, %v1366_v15  ;;  %v231_v24 = vmax.f32 %v155_v20, 0.0 }
  0xdb   :  { %v160_v25 = vpop.f32.mrf.mxu0 }
  0xdc   :  { %v232_v27 = vmax.f32 %v157_v23, 0.0  ;;  %v261_v31 = vpack.c.bf16 %v231_v24, %v229_v28  ;;  %v161_v35 = vadd.f32 %v160_v25, %v1370_v16 }
  0xdd   :  { %v162_v29 = vpop.f32.mrf.mxu0 }
  0xde   :  { %v262_v30 = vpack.c.bf16 %v232_v27, %v230_v26  ;;  %v163_v33 = vadd.f32 %v162_v29, %v1366_v15  ;;  %v233_v42 = vmax.f32 %v161_v35, 0.0 }
  0xdf   :  { %v164_v32 = vpop.f32.mrf.mxu0 }
  0xe0   :  { %v165_v34 = vadd.f32 %v164_v32, %v1370_v16  ;;  %513 = vmatprep.mubr.bf16.mxu1 %v262_v30  ;;  %v234_v40 = vmax.f32 %v163_v33, 0.0 }
  0xe1   :  { %v166_v36 = vpop.f32.mrf.mxu0  ;;  %514 = vmatmul.mubr.bf16.vlgmr.msra.gmra.mxu1 %v261_v31 }
  0xe2   :  { %v167_v37 = vadd.f32 %v166_v36, %v1366_v15  ;;  %v235_v38 = vmax.f32 %v165_v34, 0.0 }
  0xe3   :  { %v170_v39 = vpop.f32.mrf.mxu0 }
  0xe4   :  { %v236_v41 = vmax.f32 %v167_v37, 0.0  ;;  %v263_v45 = vpack.c.bf16 %v235_v38, %v233_v42  ;;  %v171_v49 = vadd.f32 %v170_v39, %v1370_v16 }
  0xe5   :  { %v172_v43 = vpop.f32.mrf.mxu0 }
  0xe6   :  { %v264_v44 = vpack.c.bf16 %v236_v41, %v234_v40  ;;  %v173_v47 = vadd.f32 %v172_v43, %v1366_v15  ;;  %v237_v56 = vmax.f32 %v171_v49, 0.0 }
  0xe7   :  { %v174_v46 = vpop.f32.mrf.mxu0 }
  0xe8   :  { %v175_v48 = vadd.f32 %v174_v46, %v1370_v16  ;;  %523 = vmatprep.mubr.bf16.mxu1 %v264_v44  ;;  %v238_v54 = vmax.f32 %v173_v47, 0.0 }
  0xe9   :  { %v176_v50 = vpop.f32.mrf.mxu0  ;;  %524 = vmatmul.mubr.bf16.gmra.mxu1 %v263_v45 }
  0xea   :  { %v177_v51 = vadd.f32 %v176_v50, %v1366_v15  ;;  %v239_v52 = vmax.f32 %v175_v48, 0.0 }
  0xeb   :  { %v180_v53 = vpop.f32.mrf.mxu0 }
  0xec   :  { %v240_v55 = vmax.f32 %v177_v51, 0.0  ;;  %v265_v59 = vpack.c.bf16 %v239_v52, %v237_v56  ;;  %v181_v63 = vadd.f32 %v180_v53, %v1370_v16 }
  0xed   :  { %v182_v57 = vpop.f32.mrf.mxu0 }
  0xee   :  { %v266_v58 = vpack.c.bf16 %v240_v55, %v238_v54  ;;  %v183_v61 = vadd.f32 %v182_v57, %v1366_v15  ;;  %v241_v6 = vmax.f32 %v181_v63, 0.0 }
  0xef   :  { %v184_v60 = vpop.f32.mrf.mxu0 }
  0xf0   :  { %v185_v62 = vadd.f32 %v184_v60, %v1370_v16  ;;  %533 = vmatprep.mubr.bf16.mxu1 %v266_v58  ;;  %v242_v4 = vmax.f32 %v183_v61, 0.0 }
  0xf1   :  { %v186_v0 = vpop.f32.mrf.mxu0  ;;  %534 = vmatmul.mubr.bf16.gmra.mxu1 %v265_v59 }
  0xf2   :  { %v187_v1 = vadd.f32 %v186_v0, %v1366_v15  ;;  %v243_v2 = vmax.f32 %v185_v62, 0.0 }
  0xf3   :  { %v190_v3 = vpop.f32.mrf.mxu0 }
  0xf4   :  { %v244_v5 = vmax.f32 %v187_v1, 0.0  ;;  %v267_v13 = vpack.c.bf16 %v243_v2, %v241_v6  ;;  %v191_v19 = vadd.f32 %v190_v3, %v1370_v16  ;;  %v1150_v6 = vld [vmem:[%s1499_s5 + $0x40] sm:$0xff]  }
  0xf5   :  { %v192_v7 = vpop.f32.mrf.mxu0  ;;  %1030 = vmatprep.subr.bf16.mxu0 %v1150_v6 }
  0xf6   :  { %v268_v8 = vpack.c.bf16 %v244_v5, %v242_v4  ;;  %v193_v17 = vadd.f32 %v192_v7, %v1366_v15  ;;  %v245_v26 = vmax.f32 %v191_v19, 0.0 }
  0xf7   :  { %v194_v14 = vpop.f32.mrf.mxu0 }
  0xf8   :  { %v195_v18 = vadd.f32 %v194_v14, %v1370_v16  ;;  %543 = vmatprep.mubr.bf16.mxu1 %v268_v8  ;;  %v246_v24 = vmax.f32 %v193_v17, 0.0 }
  0xf9   :  { %v196_v20 = vpop.f32.mrf.mxu0  ;;  %544 = vmatmul.mubr.bf16.gmra.mxu1 %v267_v13 }
  0xfa   :  { %v197_v21 = vadd.f32 %v196_v20, %v1366_v15  ;;  %v247_v22 = vmax.f32 %v195_v18, 0.0 }
  0xfb   :  { %v200_v23 = vpop.f32.mrf.mxu0 }
  0xfc   :  { %v248_v25 = vmax.f32 %v197_v21, 0.0  ;;  %v269_v29 = vpack.c.bf16 %v247_v22, %v245_v26  ;;  %v201_v33 = vadd.f32 %v200_v23, %v1370_v16 }
  0xfd   :  { %v202_v27 = vpop.f32.mrf.mxu0 }
  0xfe   :  { %v270_v28 = vpack.c.bf16 %v248_v25, %v246_v24  ;;  %v203_v31 = vadd.f32 %v202_v27, %v1366_v15  ;;  %v249_v40 = vmax.f32 %v201_v33, 0.0 }
  0xff   :  { %v204_v30 = vpop.f32.mrf.mxu0 }
 0x100   :  { %v205_v32 = vadd.f32 %v204_v30, %v1370_v16  ;;  %553 = vmatprep.mubr.bf16.mxu1 %v270_v28  ;;  %v250_v38 = vmax.f32 %v203_v31, 0.0 }
 0x101   :  { %v206_v34 = vpop.f32.mrf.mxu0  ;;  %554 = vmatmul.mubr.bf16.gmra.mxu1 %v269_v29 }
 0x102   :  { %v207_v35 = vadd.f32 %v206_v34, %v1366_v15  ;;  %v251_v36 = vmax.f32 %v205_v32, 0.0 }
 0x103   :  { %v210_v37 = vpop.f32.mrf.mxu0 }
 0x104   :  { %v252_v39 = vmax.f32 %v207_v35, 0.0  ;;  %v271_v43 = vpack.c.bf16 %v251_v36, %v249_v40  ;;  %v211_v47 = vadd.f32 %v210_v37, %v1370_v16 }
 0x105   :  { %v212_v41 = vpop.f32.mrf.mxu0 }
 0x106   :  { %v272_v42 = vpack.c.bf16 %v252_v39, %v250_v38  ;;  %v213_v45 = vadd.f32 %v212_v41, %v1366_v15  ;;  %v253_v54 = vmax.f32 %v211_v47, 0.0 }
 0x107   :  { %v214_v44 = vpop.f32.mrf.mxu0 }
 0x108   :  { %v215_v46 = vadd.f32 %v214_v44, %v1370_v16  ;;  %563 = vmatprep.mubr.bf16.mxu1 %v272_v42  ;;  %v254_v52 = vmax.f32 %v213_v45, 0.0 }
 0x109   :  { %v216_v48 = vpop.f32.mrf.mxu0  ;;  %564 = vmatmul.mubr.bf16.gmra.mxu1 %v271_v43 }
 0x10a   :  { %v217_v49 = vadd.f32 %v216_v48, %v1366_v15  ;;  %v255_v50 = vmax.f32 %v215_v46, 0.0 }
 0x10b   :  { %v220_v51 = vpop.f32.mrf.mxu0 }
 0x10c   :  { %v256_v53 = vmax.f32 %v217_v49, 0.0  ;;  %v273_v57 = vpack.c.bf16 %v255_v50, %v253_v54  ;;  %v221_v61 = vadd.f32 %v220_v51, %v1370_v16 }
 0x10d   :  { %v222_v55 = vpop.f32.mrf.mxu0 }
 0x10e   :  { %v274_v56 = vpack.c.bf16 %v256_v53, %v254_v52  ;;  %v223_v59 = vadd.f32 %v222_v55, %v1366_v15  ;;  %v257_v3 = vmax.f32 %v221_v61, 0.0 }
 0x10f   :  { %v224_v58 = vpop.f32.mrf.mxu0 }
 0x110   :  { %v225_v60 = vadd.f32 %v224_v58, %v1370_v16  ;;  %573 = vmatprep.mubr.bf16.mxu1 %v274_v56  ;;  %v258_v1 = vmax.f32 %v223_v59, 0.0  ;;  %v1151_v16 = vld [vmem:[%s1499_s5] sm:$0xff]  }
 0x111   :  { %v226_v62 = vpop.f32.mrf.mxu0  ;;  %574 = vmatmul.mubr.bf16.gmra.mxu1 %v273_v57  ;;  %1031 = vmatpush3.bf16.msra.mxu0 %v1151_v16 }
 0x112   :  { %v227_v63 = vadd.f32 %v226_v62, %v1366_v15  ;;  %v259_v0 = vmax.f32 %v225_v60, 0.0  ;;  %v309_v15 = vld [vmem:[%s1498_s4] sm:$0x3] }
 0x113   :  { %v1415_v8 = vrot.slane %v309_v15, %v77_v11  ;;  %v1419_v13 = vrot.slane %v309_v15, %v73_v12 }
 0x114   :  { %v260_v2 = vmax.f32 %v227_v63, 0.0  ;;  %v275_v5 = vpack.c.bf16 %v259_v0, %v257_v3 }
 0x116   :  { %v276_v4 = vpack.c.bf16 %v260_v2, %v258_v1 }
 0x118   :  { %583 = vmatprep.mubr.bf16.mxu1 %v276_v4 }
 0x119   :  { %584 = vmatmul.mubr.bf16.gmra.mxu1 %v275_v5 }
 0x1a1   :  { %v515_v7 = vpop.f32.mrf.mxu1 }
 0x1a2   :  { %v516_v20 = vadd.f32 %v515_v7, %v1419_v13 }
 0x1a3   :  { %v517_v14 = vpop.f32.mrf.mxu1 }
 0x1a4   :  { %v518_v18 = vadd.f32 %v517_v14, %v1415_v8  ;;  %v594_v26 = vmax.f32 %v516_v20, 0.0 }
 0x1a5   :  { %v519_v17 = vpop.f32.mrf.mxu1 }
 0x1a6   :  { %v520_v19 = vadd.f32 %v519_v17, %v1419_v13  ;;  %v595_v25 = vmax.f32 %v518_v18, 0.0 }
 0x1a7   :  { %v521_v21 = vpop.f32.mrf.mxu1 }
 0x1a8   :  { %v522_v22 = vadd.f32 %v521_v21, %v1415_v8  ;;  %v596_v23 = vmax.f32 %v520_v19, 0.0 }
 0x1a9   :  { %v525_v24 = vpop.f32.mrf.mxu1 }
 0x1aa   :  { %v597_v11 = vmax.f32 %v522_v22, 0.0  ;;  %v626_v12 = vpack.c.bf16 %v596_v23, %v594_v26  ;;  %v526_v32 = vadd.f32 %v525_v24, %v1419_v13 }
 0x1ab   :  { %v527_v27 = vpop.f32.mrf.mxu1 }
 0x1ac   :  { %v627_v28 = vpack.c.bf16 %v597_v11, %v595_v25  ;;  %v528_v30 = vadd.f32 %v527_v27, %v1415_v8  ;;  %v598_v39 = vmax.f32 %v526_v32, 0.0 }
 0x1ad   :  { %v529_v29 = vpop.f32.mrf.mxu1 }
 0x1ae   :  { %v530_v31 = vadd.f32 %v529_v29, %v1419_v13  ;;  %802 = vmatprep.mubr.bf16.mxu0 %v627_v28  ;;  %v599_v37 = vmax.f32 %v528_v30, 0.0 }
 0x1af   :  { %v531_v33 = vpop.f32.mrf.mxu1  ;;  %803 = vmatmul.mubr.bf16.vlgmr.msra.gmra.mxu0 %v626_v12 }
 0x1b0   :  { %v532_v34 = vadd.f32 %v531_v33, %v1415_v8  ;;  %v600_v35 = vmax.f32 %v530_v31, 0.0 }
 0x1b1   :  { %v535_v36 = vpop.f32.mrf.mxu1 }
 0x1b2   :  { %v601_v38 = vmax.f32 %v532_v34, 0.0  ;;  %v628_v42 = vpack.c.bf16 %v600_v35, %v598_v39  ;;  %v536_v46 = vadd.f32 %v535_v36, %v1419_v13 }
 0x1b3   :  { %v537_v40 = vpop.f32.mrf.mxu1 }
 0x1b4   :  { %v629_v41 = vpack.c.bf16 %v601_v38, %v599_v37  ;;  %v538_v44 = vadd.f32 %v537_v40, %v1415_v8  ;;  %v602_v53 = vmax.f32 %v536_v46, 0.0 }
 0x1b5   :  { %v539_v43 = vpop.f32.mrf.mxu1 }
 0x1b6   :  { %v540_v45 = vadd.f32 %v539_v43, %v1419_v13  ;;  %810 = vmatprep.mubr.bf16.mxu0 %v629_v41  ;;  %v603_v51 = vmax.f32 %v538_v44, 0.0 }
 0x1b7   :  { %v541_v47 = vpop.f32.mrf.mxu1  ;;  %811 = vmatmul.mubr.bf16.gmra.mxu0 %v628_v42 }
 0x1b8   :  { %v542_v48 = vadd.f32 %v541_v47, %v1415_v8  ;;  %v604_v49 = vmax.f32 %v540_v45, 0.0 }
 0x1b9   :  { %v545_v50 = vpop.f32.mrf.mxu1 }
 0x1ba   :  { %v605_v52 = vmax.f32 %v542_v48, 0.0  ;;  %v630_v56 = vpack.c.bf16 %v604_v49, %v602_v53  ;;  %v546_v60 = vadd.f32 %v545_v50, %v1419_v13 }
 0x1bb   :  { %v547_v54 = vpop.f32.mrf.mxu1 }
 0x1bc   :  { %v631_v55 = vpack.c.bf16 %v605_v52, %v603_v51  ;;  %v548_v58 = vadd.f32 %v547_v54, %v1415_v8  ;;  %v606_v3 = vmax.f32 %v546_v60, 0.0 }
 0x1bd   :  { %v549_v57 = vpop.f32.mrf.mxu1 }
 0x1be   :  { %v550_v59 = vadd.f32 %v549_v57, %v1419_v13  ;;  %818 = vmatprep.mubr.bf16.mxu0 %v631_v55  ;;  %v607_v1 = vmax.f32 %v548_v58, 0.0 }
 0x1bf   :  { %v551_v61 = vpop.f32.mrf.mxu1  ;;  %819 = vmatmul.mubr.bf16.gmra.mxu0 %v630_v56 }
 0x1c0   :  { %v552_v62 = vadd.f32 %v551_v61, %v1415_v8  ;;  %v608_v63 = vmax.f32 %v550_v59, 0.0 }
 0x1c1   :  { %v555_v0 = vpop.f32.mrf.mxu1 }
 0x1c2   :  { %v609_v2 = vmax.f32 %v552_v62, 0.0  ;;  %v632_v6 = vpack.c.bf16 %v608_v63, %v606_v3  ;;  %v556_v14 = vadd.f32 %v555_v0, %v1419_v13 }
 0x1c3   :  { %v557_v4 = vpop.f32.mrf.mxu1 }
 0x1c4   :  { %v633_v5 = vpack.c.bf16 %v609_v2, %v607_v1  ;;  %v558_v15 = vadd.f32 %v557_v4, %v1415_v8  ;;  %v610_v23 = vmax.f32 %v556_v14, 0.0 }
 0x1c5   :  { %v559_v16 = vpop.f32.mrf.mxu1 }
 0x1c6   :  { %v560_v7 = vadd.f32 %v559_v16, %v1419_v13  ;;  %826 = vmatprep.mubr.bf16.mxu0 %v633_v5  ;;  %v611_v21 = vmax.f32 %v558_v15, 0.0 }
 0x1c7   :  { %v561_v17 = vpop.f32.mrf.mxu1  ;;  %827 = vmatmul.mubr.bf16.gmra.mxu0 %v632_v6 }
 0x1c8   :  { %v562_v18 = vadd.f32 %v561_v17, %v1415_v8  ;;  %v612_v19 = vmax.f32 %v560_v7, 0.0 }
 0x1c9   :  { %v565_v20 = vpop.f32.mrf.mxu1 }
 0x1ca   :  { %v613_v22 = vmax.f32 %v562_v18, 0.0  ;;  %v634_v11 = vpack.c.bf16 %v612_v19, %v610_v23  ;;  %v566_v12 = vadd.f32 %v565_v20, %v1419_v13  ;;  %v869_v19 = vadd.s32 8, %v1357_v10 }
 0x1cb   :  { %v567_v24 = vpop.f32.mrf.mxu1 }
 0x1cc   :  { %v635_v25 = vpack.c.bf16 %v613_v22, %v611_v21  ;;  %v568_v27 = vadd.f32 %v567_v24, %v1415_v8  ;;  %v614_v35 = vmax.f32 %v566_v12, 0.0  ;;  %v1455_v21 = vand.u32 127, %v71_v9 }
 0x1cd   :  { %v569_v26 = vpop.f32.mrf.mxu1  ;;  %v870_v22 = vadd.s32 16, %v1357_v10 }
 0x1ce   :  { %v570_v28 = vadd.f32 %v569_v26, %v1419_v13  ;;  %834 = vmatprep.mubr.bf16.mxu0 %v635_v25  ;;  %v615_v33 = vmax.f32 %v568_v27, 0.0  ;;  %vm887_vm1 = vcmp.eq.s32.totalorder %v869_v19, %v1455_v21  ;;  %v871_v25 = vadd.s32 24, %v1357_v10 }
 0x1cf   :  { %v571_v29 = vpop.f32.mrf.mxu1  ;;  %835 = vmatmul.mubr.bf16.gmra.mxu0 %v634_v11  ;;  %vm886_vm2 = vcmp.eq.s32.totalorder %v1357_v10, %v1455_v21  ;;  %vm888_vm3 = vcmp.eq.s32.totalorder %v870_v22, %v1455_v21 }
 0x1d0   :  { %v572_v30 = vadd.f32 %v571_v29, %v1415_v8  ;;  %v616_v31 = vmax.f32 %v570_v28, 0.0  ;;  %v872_v28 = vadd.s32 32, %v1357_v10  ;;  %vm889_vm4 = vcmp.eq.s32.totalorder %v871_v25, %v1455_v21 }
 0x1d1   :  { %v575_v32 = vpop.f32.mrf.mxu1 }
 0x1d2   :  { %v617_v34 = vmax.f32 %v572_v30, 0.0  ;;  %v636_v38 = vpack.c.bf16 %v616_v31, %v614_v35  ;;  %v576_v42 = vadd.f32 %v575_v32, %v1419_v13  ;;  %v873_v30 = vadd.s32 40, %v1357_v10 }
 0x1d3   :  { %v577_v36 = vpop.f32.mrf.mxu1  ;;  %vm890_vm5 = vcmp.eq.s32.totalorder %v872_v28, %v1455_v21 }
 0x1d4   :  { %v637_v37 = vpack.c.bf16 %v617_v34, %v615_v33  ;;  %v578_v40 = vadd.f32 %v577_v36, %v1415_v8  ;;  %v618_v49 = vmax.f32 %v576_v42, 0.0  ;;  %v874_v36 = vadd.s32 48, %v1357_v10 }
 0x1d5   :  { %v579_v39 = vpop.f32.mrf.mxu1  ;;  %vm891_vm6 = vcmp.eq.s32.totalorder %v873_v30, %v1455_v21 }
 0x1d6   :  { %v580_v41 = vadd.f32 %v579_v39, %v1419_v13  ;;  %842 = vmatprep.mubr.bf16.mxu0 %v637_v37  ;;  %v619_v47 = vmax.f32 %v578_v40, 0.0  ;;  %vm892_vm7 = vcmp.eq.s32.totalorder %v874_v36, %v1455_v21 }
 0x1d7   :  { %v581_v43 = vpop.f32.mrf.mxu1  ;;  %843 = vmatmul.mubr.bf16.gmra.mxu0 %v636_v38 }
 0x1d8   :  { %v582_v44 = vadd.f32 %v581_v43, %v1415_v8  ;;  %v620_v45 = vmax.f32 %v580_v41, 0.0  ;;  %v875_v41 = vadd.s32 56, %v1357_v10 }
 0x1d9   :  { %v585_v46 = vpop.f32.mrf.mxu1 }
 0x1da   :  { %v621_v48 = vmax.f32 %v582_v44, 0.0  ;;  %v638_v52 = vpack.c.bf16 %v620_v45, %v618_v49  ;;  %v586_v56 = vadd.f32 %v585_v46, %v1419_v13  ;;  %v876_v46 = vadd.s32 64, %v1357_v10 }
 0x1db   :  { %v587_v50 = vpop.f32.mrf.mxu1  ;;  %vm893_vm8 = vcmp.eq.s32.totalorder %v875_v41, %v1455_v21 }
 0x1dc   :  { %v639_v51 = vpack.c.bf16 %v621_v48, %v619_v47  ;;  %v588_v54 = vadd.f32 %v587_v50, %v1415_v8  ;;  %v622_v62 = vmax.f32 %v586_v56, 0.0  ;;  %vm894_vm9 = vcmp.eq.s32.totalorder %v876_v46, %v1455_v21 }
 0x1dd   :  { %v589_v53 = vpop.f32.mrf.mxu1  ;;  %v878_v56 = vadd.s32 80, %v1357_v10 }
 0x1de   :  { %v590_v55 = vadd.f32 %v589_v53, %v1419_v13  ;;  %850 = vmatprep.mubr.bf16.mxu0 %v639_v51  ;;  %v623_v60 = vmax.f32 %v588_v54, 0.0  ;;  %v877_v51 = vadd.s32 72, %v1357_v10 }
 0x1df   :  { %v591_v57 = vpop.f32.mrf.mxu1  ;;  %851 = vmatmul.mubr.bf16.gmra.mxu0 %v638_v52  ;;  %vm896_vm11 = vcmp.eq.s32.totalorder %v878_v56, %v1455_v21 }
 0x1e0   :  { %v592_v58 = vadd.f32 %v591_v57, %v1415_v8  ;;  %v624_v59 = vmax.f32 %v590_v55, 0.0  ;;  %vm895_vm10 = vcmp.eq.s32.totalorder %v877_v51, %v1455_v21 }
 0x1e2   :  { %v625_v61 = vmax.f32 %v592_v58, 0.0  ;;  %v640_v0 = vpack.c.bf16 %v624_v59, %v622_v62 }
 0x1e4   :  { %v641_v63 = vpack.c.bf16 %v625_v61, %v623_v60  ;;  %v879_v61 = vadd.s32 88, %v1357_v10 }
 0x1e6   :  { %858 = vmatprep.mubr.bf16.mxu0 %v641_v63  ;;  %vm897_vm12 = vcmp.eq.s32.totalorder %v879_v61, %v1455_v21 }
 0x1e7   :  { %859 = vmatmul.mubr.bf16.gmra.mxu0 %v640_v0 }
 0x26f   :  { %v1032_v1 = vpop.f32.mrf.mxu0 }
 0x271   :  { %v1033_v2 = vpop.f32.mrf.mxu0 }
 0x272   :  { %v1034_v26 = vadd.f32 %v1033_v2, %v1032_v1 }
 0x273   :  { %v1035_v3 = vpop.f32.mrf.mxu0 }
 0x274   :  { %v903_v32 = vsel %vm886_vm2, %v1034_v26, 0.0 }
 0x275   :  { %v1036_v4 = vpop.f32.mrf.mxu0 }
 0x276   :  { %v1037_v24 = vadd.f32 %v1036_v4, %v1035_v3  ;;  %v880_v3 = vadd.s32 96, %v1357_v10 }
 0x277   :  { %v1038_v5 = vpop.f32.mrf.mxu0 }
 0x278   :  { %v904_v12 = vsel %vm887_vm1, %v1037_v24, 0.0  ;;  %vm898_vm13 = vcmp.eq.s32.totalorder %v880_v3, %v1455_v21 }
 0x279   :  { %v1039_v6 = vpop.f32.mrf.mxu0  ;;  %v919_v35 = vadd.f32 %v904_v12, %v903_v32 }
 0x27a   :  { %v1040_v27 = vadd.f32 %v1039_v6, %v1038_v5 }
 0x27b   :  { %v1041_v16 = vpop.f32.mrf.mxu0 }
 0x27c   :  { %v905_v33 = vsel %vm888_vm3, %v1040_v27, 0.0 }
 0x27d   :  { %v1042_v13 = vpop.f32.mrf.mxu0  ;;  %v920_v40 = vadd.f32 %v919_v35, %v905_v33 }
 0x27e   :  { %v1043_v29 = vadd.f32 %v1042_v13, %v1041_v16  ;;  %v881_v13 = vadd.s32 104, %v1357_v10 }
 0x27f   :  { %v1044_v15 = vpop.f32.mrf.mxu0 }
 0x280   :  { %v906_v38 = vsel %vm889_vm4, %v1043_v29, 0.0  ;;  %vm899_vm14 = vcmp.eq.s32.totalorder %v881_v13, %v1455_v21 }
 0x281   :  { %v1045_v7 = vpop.f32.mrf.mxu0  ;;  %v921_v45 = vadd.f32 %v920_v40, %v906_v38 }
 0x282   :  { %v1046_v34 = vadd.f32 %v1045_v7, %v1044_v15 }
 0x283   :  { %v1047_v14 = vpop.f32.mrf.mxu0 }
 0x284   :  { %v907_v43 = vsel %vm890_vm5, %v1046_v34, 0.0 }
 0x285   :  { %v1048_v8 = vpop.f32.mrf.mxu0  ;;  %v922_v50 = vadd.f32 %v921_v45, %v907_v43 }
 0x286   :  { %v1049_v39 = vadd.f32 %v1048_v8, %v1047_v14 }
 0x287   :  { %v1050_v17 = vpop.f32.mrf.mxu0 }
 0x288   :  { %v908_v48 = vsel %vm891_vm6, %v1049_v39, 0.0 }
 0x289   :  { %v1051_v18 = vpop.f32.mrf.mxu0  ;;  %v923_v55 = vadd.f32 %v922_v50, %v908_v48 }
 0x28a   :  { %v1052_v44 = vadd.f32 %v1051_v18, %v1050_v17  ;;  %v882_v17 = vadd.s32 112, %v1357_v10 }
 0x28b   :  { %v1053_v20 = vpop.f32.mrf.mxu0 }
 0x28c   :  { %v909_v53 = vsel %vm892_vm7, %v1052_v44, 0.0  ;;  %vm900_vm15 = vcmp.eq.s32.totalorder %v882_v17, %v1455_v21 }
 0x28d   :  { %v1054_v23 = vpop.f32.mrf.mxu0  ;;  %v924_v60 = vadd.f32 %v923_v55, %v909_v53 }
 0x28e   :  { %v1055_v49 = vadd.f32 %v1054_v23, %v1053_v20 }
 0x28f   :  { %v1056_v11 = vpop.f32.mrf.mxu0 }
 0x290   :  { %v910_v58 = vsel %vm893_vm8, %v1055_v49, 0.0 }
 0x291   :  { %v1057_v9 = vpop.f32.mrf.mxu0  ;;  %v925_v1 = vadd.f32 %v924_v60, %v910_v58 }
 0x292   :  { %v1058_v54 = vadd.f32 %v1057_v9, %v1056_v11  ;;  %v883_v11 = vadd.s32 120, %v1357_v10  ;;  %v940_v10 = vstv %s1500_s6 }
 0x293   :  { %v1059_v31 = vpop.f32.mrf.mxu0 }
 0x294   :  { %v911_v63 = vsel %vm894_vm9, %v1058_v54, 0.0  ;;  %vm901_vm0 = vcmp.eq.s32.totalorder %v883_v11, %v1455_v21 }
 0x295   :  { %v1060_v37 = vpop.f32.mrf.mxu0  ;;  %v926_v6 = vadd.f32 %v925_v1, %v911_v63 }
 0x296   :  { %v1061_v59 = vadd.f32 %v1060_v37, %v1059_v31 }
 0x297   :  { %v1062_v42 = vpop.f32.mrf.mxu0 }
 0x298   :  { %v912_v4 = vsel %vm895_vm10, %v1061_v59, 0.0 }
 0x299   :  { %v1063_v47 = vpop.f32.mrf.mxu0  ;;  %v927_v14 = vadd.f32 %v926_v6, %v912_v4 }
 0x29a   :  { %v1064_v0 = vadd.f32 %v1063_v47, %v1062_v42 }
 0x29b   :  { %v1065_v52 = vpop.f32.mrf.mxu0 }
 0x29c   :  { %v913_v15 = vsel %vm896_vm11, %v1064_v0, 0.0 }
 0x29d   :  { %v1066_v57 = vpop.f32.mrf.mxu0  ;;  %v928_v20 = vadd.f32 %v927_v14, %v913_v15 }
 0x29e   :  { %v1067_v5 = vadd.f32 %v1066_v57, %v1065_v52 }
 0x29f   :  { %v1068_v62 = vpop.f32.mrf.mxu0 }
 0x2a0   :  { %v914_v18 = vsel %vm897_vm12, %v1067_v5, 0.0 }
 0x2a1   :  { %v1069_v2 = vpop.f32.mrf.mxu0  ;;  %v929_v24 = vadd.f32 %v928_v20, %v914_v18 }
 0x2a2   :  { %v1070_v7 = vadd.f32 %v1069_v2, %v1068_v62 }
 0x2a3   :  { %v1071_v16 = vpop.f32.mrf.mxu0 }
 0x2a4   :  { %v915_v23 = vsel %vm898_vm13, %v1070_v7, 0.0 }
 0x2a5   :  { %v1072_v8 = vpop.f32.mrf.mxu0  ;;  %v930_v28 = vadd.f32 %v929_v24, %v915_v23 }
 0x2a6   :  { %v1073_v19 = vadd.f32 %v1072_v8, %v1071_v16 }
 0x2a7   :  { %v1074_v22 = vpop.f32.mrf.mxu0 }
 0x2a8   :  { %v916_v26 = vsel %vm899_vm14, %v1073_v19, 0.0 }
 0x2a9   :  { %v1075_v25 = vpop.f32.mrf.mxu0  ;;  %v931_v29 = vadd.f32 %v930_v28, %v916_v26 }
 0x2aa   :  { %v1076_v27 = vadd.f32 %v1075_v25, %v1074_v22 }
 0x2ab   :  { %v1077_v9 = vpop.f32.mrf.mxu0 }
 0x2ac   :  { %v917_v12 = vsel %vm900_vm15, %v1076_v27, 0.0 }
 0x2ad   :  { %v1078_v30 = vpop.f32.mrf.mxu0  ;;  %v932_v32 = vadd.f32 %v931_v29, %v917_v12 }
 0x2ae   :  { %v1079_v31 = vadd.f32 %v1078_v30, %v1077_v9 }
 0x2b0   :  { %v918_v33 = vsel %vm901_vm0, %v1079_v31, 0.0 }
 0x2b1   :  { %v933_v34 = vadd.f32 %v932_v32, %v918_v33 }
 0x2b3   :  { %v934_v35 = vrot.slane %v933_v34, 4 }
 0x2b5   :  { %v935_v36 = vadd.f32 %v934_v35, %v933_v34 }
 0x2b7   :  { %v936_v37 = vrot.slane %v935_v36, 2 }
 0x2b9   :  { %v937_v38 = vadd.f32 %v936_v37, %v935_v36 }
 0x2bb   :  { %v938_v39 = vrot.slane %v937_v38, 1 }
 0x2bd   :  { %v939_v40 = vadd.f32 %v938_v39, %v937_v38 }
 0x2bf   :  { %v941_v41 = vadd.f32 %v940_v10, %v939_v40 }
 0x2c1   :  { %942 = vst [vmem:[#allocation6] sm:$0x1] %v941_v41 }
 0x2c2   :  { %1183 = shalt.err (!%p1180_p9)
}
 0x2c3   :  { %952 = dma.vmem_to_hbm [thread:$0]  %s950_s26, 16, %s1501_s7, [#allocation5]  }
 0x2c4   :  { %1194 = dma.done.wait [#allocation5], 16  }
 0x2c5   :  { %1195 = vsyncadd [#allocation5], 4294967280 }
 0x2c6   :  { %956 = vsyncpa [#allocation4], 1 }
 0x2c7   :  { %957 = vsyncpa [#allocation5], 1 }

</bundles_post_ra>
